<compile_context>
chip_gen: v5e
topology: v5e:2x2
jax: 0.10.0
libtpu: 0.0.40
codegen_flags: <defaults>
</compile_context>

<pallas_src>
import jax
import jax.numpy as jnp
from jax.experimental import pallas as pl
from jax.experimental.pallas import tpu as pltpu


def _vae_kernel(x_ref, noise_ref,
                w1_ref, b1_ref, w2_ref, b2_ref,
                w3_ref, b3_ref, w4_ref, b4_ref,
                out_ref, enc_ref):
    x = x_ref[...]

    # ---- encoder: Linear(img_size, h_dim) -> LeakyReLU(0.2) -> Linear(h_dim, 2*z_dim)
    h = jnp.dot(x, w1_ref[...], preferred_element_type=jnp.float32) + b1_ref[...]
    h = jnp.maximum(h, 0.2 * h)                          # LeakyReLU(0.2)
    enc = jnp.dot(h, w2_ref[...], preferred_element_type=jnp.float32) + b2_ref[...]

    # packed [mean | log_var] -> single 128-lane-dense store (split in wrapper)
    enc_ref[...] = enc

    # ---- reparameterize: z = mean + eps * exp(log_var / 2)
    z_dim = noise_ref.shape[-1]
    z = enc[:, :z_dim] + noise_ref[...] * jnp.exp(enc[:, z_dim:] * 0.5)

    # ---- decoder: Linear(z_dim, h_dim) -> ReLU -> Linear(h_dim, img_size) -> Sigmoid
    d = jnp.dot(z, w3_ref[...], preferred_element_type=jnp.float32) + b3_ref[...]
    d = jnp.maximum(d, 0.0)                              # ReLU
    o = jnp.dot(d, w4_ref[...], preferred_element_type=jnp.float32) + b4_ref[...]
    # sigmoid: exp + approx reciprocal both hit the EUP slot (VALU stays free)
    out_ref[...] = pl.reciprocal(1.0 + jnp.exp(-o), approx=True)


def vae_forward(x, noise, params, *, batch_tile=8):
    """Full VAE forward in one Pallas kernel, gridded over the batch dimension.

    x:      (B, img_size) float32
    noise:  (B, z_dim) float32   -- standard-normal samples (torch.randn equivalent)
    params: dict of weights (in, out) and biases (1, out)

    Returns (out, mean, log_var) matching the PyTorch module's forward().
    """
    B, img_size = x.shape
    z_dim = noise.shape[1]
    h_dim = params["w1"].shape[1]

    assert B % batch_tile == 0, "batch must be a multiple of the batch tile"
    tb = batch_tile
    grid = (B // tb,)

    # batched activations: tile over batch rows
    batched = lambda cols: pl.BlockSpec((tb, cols), lambda i: (i, 0))
    # weights/biases: constant index_map -> resident in VMEM across grid steps
    resident = lambda shape: pl.BlockSpec(shape, lambda i: (0, 0))

    inputs = (x, noise,
              params["w1"], params["b1"], params["w2"], params["b2"],
              params["w3"], params["b3"], params["w4"], params["b4"])

    in_specs = [
        batched(img_size),                 # x
        batched(z_dim),                    # noise
        resident(params["w1"].shape), resident(params["b1"].shape),
        resident(params["w2"].shape), resident(params["b2"].shape),
        resident(params["w3"].shape), resident(params["b3"].shape),
        resident(params["w4"].shape), resident(params["b4"].shape),
    ]

    out_shapes = (
        jax.ShapeDtypeStruct((B, img_size), jnp.float32),   # out
        jax.ShapeDtypeStruct((B, 2 * z_dim), jnp.float32),  # packed [mean | log_var]
    )
    out_specs = (batched(img_size), batched(2 * z_dim))

    # advisory cost estimate for XLA scheduling
    flops = 2 * B * (img_size * h_dim + h_dim * 2 * z_dim
                     + z_dim * h_dim + h_dim * img_size)
    transcendentals = B * (z_dim + img_size)               # exp (reparam) + exp (sigmoid)
    bytes_accessed = 4 * (x.size + noise.size
                          + sum(int(p.size) for p in params.values())
                          + B * img_size + B * 2 * z_dim)

    out, enc = pl.pallas_call(
        _vae_kernel,
        out_shape=out_shapes,
        grid=grid,
        in_specs=in_specs,
        out_specs=out_specs,
        compiler_params=pltpu.CompilerParams(
            dimension_semantics=("parallel",)),
        cost_estimate=pl.CostEstimate(
            flops=flops,
            transcendentals=transcendentals,
            bytes_accessed=bytes_accessed),
    )(*inputs)

    # torch.chunk(h, 2, dim=1) done outside the kernel (free; keeps kernel
    # stores lane-dense instead of two masked 64-lane stores)
    mean, log_var = enc[:, :z_dim], enc[:, z_dim:]
    return out, mean, log_var


def init_params(key, img_size, h_dim, z_dim):
    """Deterministic parameter init (shapes follow the module's nn.Linear layers)."""
    ks = jax.random.split(key, 8)

    def lin(kw, kb, fan_in, fan_out):
        scale = 1.0 / jnp.sqrt(fan_in)
        w = jax.random.uniform(kw, (fan_in, fan_out), jnp.float32, -scale, scale)
        b = jax.random.uniform(kb, (1, fan_out), jnp.float32, -scale, scale)
        return w, b

    w1, b1 = lin(ks[0], ks[1], img_size, h_dim)        # encoder Linear 1
    w2, b2 = lin(ks[2], ks[3], h_dim, 2 * z_dim)       # encoder Linear 2
    w3, b3 = lin(ks[4], ks[5], z_dim, h_dim)           # decoder Linear 1
    w4, b4 = lin(ks[6], ks[7], h_dim, img_size)        # decoder Linear 2
    return dict(w1=w1, b1=b1, w2=w2, b2=b2, w3=w3, b3=b3, w4=w4, b4=b4)


if __name__ == "__main__":
    # cfg: img_size=256, h_dim=128, z_dim=64; batch=16 (grid of 2 tiles of 8 rows)
    B, IMG, H, Z = 16, 256, 128, 64

    key = jax.random.PRNGKey(0)
    k_x, k_n, k_p = jax.random.split(key, 3)

    x = jax.random.uniform(k_x, (B, IMG), jnp.float32)        # flattened "image"
    noise = jax.random.normal(k_n, (B, Z), jnp.float32)       # torch.randn equivalent
    params = init_params(k_p, IMG, H, Z)

    out, mean, log_var = jax.block_until_ready(vae_forward(x, noise, params))

    # lightweight sanity check against a pure-JAX reference
    h_ref = x @ params["w1"] + params["b1"]
    h_ref = jnp.where(h_ref > 0, h_ref, 0.2 * h_ref)
    enc_ref = h_ref @ params["w2"] + params["b2"]
    mean_ref, logvar_ref = enc_ref[:, :Z], enc_ref[:, Z:]
    z_ref = mean_ref + noise * jnp.exp(logvar_ref * 0.5)
    d_ref = jnp.maximum(z_ref @ params["w3"] + params["b3"], 0.0)
    out_ref = jax.nn.sigmoid(d_ref @ params["w4"] + params["b4"])

    # out uses an EUP approx reciprocal for the sigmoid -> slightly looser tol
    assert jnp.allclose(out, out_ref, atol=2e-3), "out mismatch"
    assert jnp.allclose(mean, mean_ref, atol=1e-5), "mean mismatch"
    assert jnp.allclose(log_var, logvar_ref, atol=1e-5), "log_var mismatch"

    print("KERNEL_OK")
</pallas_src>

<mosaic_0001>
module attributes {stable_mosaic.version = 11 : i64} {
  func.func @_vae_kernel(%arg0: i32, %arg1: memref<8x256xf32, #tpu.memory_space<vmem>>, %arg2: memref<8x64xf32, #tpu.memory_space<vmem>>, %arg3: memref<256x128xf32, #tpu.memory_space<vmem>>, %arg4: memref<1x128xf32, #tpu.memory_space<vmem>>, %arg5: memref<128x128xf32, #tpu.memory_space<vmem>>, %arg6: memref<1x128xf32, #tpu.memory_space<vmem>>, %arg7: memref<64x128xf32, #tpu.memory_space<vmem>>, %arg8: memref<1x128xf32, #tpu.memory_space<vmem>>, %arg9: memref<128x256xf32, #tpu.memory_space<vmem>>, %arg10: memref<1x256xf32, #tpu.memory_space<vmem>>, %arg11: memref<8x256xf32, #tpu.memory_space<vmem>>, %arg12: memref<8x128xf32, #tpu.memory_space<vmem>>) attributes {dimension_semantics = [#tpu.dimension_semantics<parallel>], iteration_bounds = array<i64: 2>, scalar_prefetch = 0 : i64, scratch_operands = 0 : i64, tpu.core_type = #tpu.core_type<tc>, window_params = [{transform_indices = @transform_0, window_bounds = array<i64: 8, 256>}, {transform_indices = @transform_1, window_bounds = array<i64: 8, 64>}, {pipeline_mode = #tpu.pipeline_mode<synchronous>, transform_indices = @transform_2, window_bounds = array<i64: 256, 128>}, {pipeline_mode = #tpu.pipeline_mode<synchronous>, transform_indices = @transform_3, window_bounds = array<i64: 1, 128>}, {pipeline_mode = #tpu.pipeline_mode<synchronous>, transform_indices = @transform_4, window_bounds = array<i64: 128, 128>}, {pipeline_mode = #tpu.pipeline_mode<synchronous>, transform_indices = @transform_5, window_bounds = array<i64: 1, 128>}, {pipeline_mode = #tpu.pipeline_mode<synchronous>, transform_indices = @transform_6, window_bounds = array<i64: 64, 128>}, {pipeline_mode = #tpu.pipeline_mode<synchronous>, transform_indices = @transform_7, window_bounds = array<i64: 1, 128>}, {pipeline_mode = #tpu.pipeline_mode<synchronous>, transform_indices = @transform_8, window_bounds = array<i64: 128, 256>}, {pipeline_mode = #tpu.pipeline_mode<synchronous>, transform_indices = @transform_9, window_bounds = array<i64: 1, 256>}, {transform_indices = @transform_10, window_bounds = array<i64: 8, 256>}, {transform_indices = @transform_11, window_bounds = array<i64: 8, 128>}]} {
    %c0 = arith.constant 0 : index
    %c0_0 = arith.constant 0 : index
    %0 = vector.load %arg1[%c0, %c0_0] : memref<8x256xf32, #tpu.memory_space<vmem>>, vector<8x256xf32>
    %c0_1 = arith.constant 0 : index
    %c0_2 = arith.constant 0 : index
    %1 = vector.load %arg3[%c0_1, %c0_2] : memref<256x128xf32, #tpu.memory_space<vmem>>, vector<256x128xf32>
    %cst = arith.constant dense<0.000000e+00> : vector<8x128xf32>
    %2 = tpu.matmul %0, %1, %cst {dimension_numbers = #tpu.dot_dimension_numbers<[1], [0], [0], [1], [0, 0, 1, 1], [], []>} : vector<8x256xf32>, vector<256x128xf32>, vector<8x128xf32> -> vector<8x128xf32>
    %c0_3 = arith.constant 0 : index
    %c0_4 = arith.constant 0 : index
    %3 = vector.load %arg4[%c0_3, %c0_4] : memref<1x128xf32, #tpu.memory_space<vmem>>, vector<1x128xf32>
    %4 = vector.broadcast %3 : vector<1x128xf32> to vector<8x128xf32>
    %5 = arith.addf %2, %4 : vector<8x128xf32>
    %cst_5 = arith.constant 2.000000e-01 : f32
    %6 = vector.broadcast %cst_5 : f32 to vector<8x128xf32>
    %7 = arith.mulf %6, %5 : vector<8x128xf32>
    %8 = arith.maximumf %5, %7 : vector<8x128xf32>
    %c0_6 = arith.constant 0 : index
    %c0_7 = arith.constant 0 : index
    %9 = vector.load %arg5[%c0_6, %c0_7] : memref<128x128xf32, #tpu.memory_space<vmem>>, vector<128x128xf32>
    %cst_8 = arith.constant dense<0.000000e+00> : vector<8x128xf32>
    %10 = tpu.matmul %8, %9, %cst_8 {dimension_numbers = #tpu.dot_dimension_numbers<[1], [0], [0], [1], [0, 0, 1, 1], [], []>} : vector<8x128xf32>, vector<128x128xf32>, vector<8x128xf32> -> vector<8x128xf32>
    %c0_9 = arith.constant 0 : index
    %c0_10 = arith.constant 0 : index
    %11 = vector.load %arg6[%c0_9, %c0_10] : memref<1x128xf32, #tpu.memory_space<vmem>>, vector<1x128xf32>
    %12 = vector.broadcast %11 : vector<1x128xf32> to vector<8x128xf32>
    %13 = arith.addf %10, %12 : vector<8x128xf32>
    %c0_11 = arith.constant 0 : index
    %c0_12 = arith.constant 0 : index
    %14 = vector.load %arg12[%c0_11, %c0_12] : memref<8x128xf32, #tpu.memory_space<vmem>>, vector<8x128xf32>
    tpu.vector_store %arg12[%c0_11, %c0_12], %13 {strides = array<i32>} : memref<8x128xf32, #tpu.memory_space<vmem>>, vector<8x128xf32>,
    %15 = vector.extract_strided_slice %13 {offsets = [0, 0], sizes = [8, 64], strides = [1, 1]} : vector<8x128xf32> to vector<8x64xf32>
    %c0_13 = arith.constant 0 : index
    %c0_14 = arith.constant 0 : index
    %16 = vector.load %arg2[%c0_13, %c0_14] : memref<8x64xf32, #tpu.memory_space<vmem>>, vector<8x64xf32>
    %17 = vector.extract_strided_slice %13 {offsets = [0, 64], sizes = [8, 64], strides = [1, 1]} : vector<8x128xf32> to vector<8x64xf32>
    %cst_15 = arith.constant 5.000000e-01 : f32
    %18 = vector.broadcast %cst_15 : f32 to vector<8x64xf32>
    %19 = arith.mulf %17, %18 : vector<8x64xf32>
    %20 = math.exp %19 : vector<8x64xf32>
    %21 = arith.mulf %16, %20 : vector<8x64xf32>
    %22 = arith.addf %15, %21 : vector<8x64xf32>
    %c0_16 = arith.constant 0 : index
    %c0_17 = arith.constant 0 : index
    %23 = vector.load %arg7[%c0_16, %c0_17] : memref<64x128xf32, #tpu.memory_space<vmem>>, vector<64x128xf32>
    %cst_18 = arith.constant dense<0.000000e+00> : vector<8x128xf32>
    %24 = tpu.matmul %22, %23, %cst_18 {dimension_numbers = #tpu.dot_dimension_numbers<[1], [0], [0], [1], [0, 0, 1, 1], [], []>} : vector<8x64xf32>, vector<64x128xf32>, vector<8x128xf32> -> vector<8x128xf32>
    %c0_19 = arith.constant 0 : index
    %c0_20 = arith.constant 0 : index
    %25 = vector.load %arg8[%c0_19, %c0_20] : memref<1x128xf32, #tpu.memory_space<vmem>>, vector<1x128xf32>
    %26 = vector.broadcast %25 : vector<1x128xf32> to vector<8x128xf32>
    %27 = arith.addf %24, %26 : vector<8x128xf32>
    %cst_21 = arith.constant 0.000000e+00 : f32
    %28 = vector.broadcast %cst_21 : f32 to vector<8x128xf32>
    %29 = arith.maximumf %27, %28 : vector<8x128xf32>
    %c0_22 = arith.constant 0 : index
    %c0_23 = arith.constant 0 : index
    %30 = vector.load %arg9[%c0_22, %c0_23] : memref<128x256xf32, #tpu.memory_space<vmem>>, vector<128x256xf32>
    %cst_24 = arith.constant dense<0.000000e+00> : vector<8x256xf32>
    %31 = tpu.matmul %29, %30, %cst_24 {dimension_numbers = #tpu.dot_dimension_numbers<[1], [0], [0], [1], [0, 0, 1, 1], [], []>} : vector<8x128xf32>, vector<128x256xf32>, vector<8x256xf32> -> vector<8x256xf32>
    %c0_25 = arith.constant 0 : index
    %c0_26 = arith.constant 0 : index
    %32 = vector.load %arg10[%c0_25, %c0_26] : memref<1x256xf32, #tpu.memory_space<vmem>>, vector<1x256xf32>
    %33 = vector.broadcast %32 : vector<1x256xf32> to vector<8x256xf32>
    %34 = arith.addf %31, %33 : vector<8x256xf32>
    %cst_27 = arith.constant 0.000000e+00 : f32
    %35 = vector.broadcast %cst_27 : f32 to vector<8x256xf32>
    %36 = arith.subf %35, %34 : vector<8x256xf32>
    %37 = math.exp %36 : vector<8x256xf32>
    %cst_28 = arith.constant 1.000000e+00 : f32
    %38 = vector.broadcast %cst_28 : f32 to vector<8x256xf32>
    %39 = arith.addf %38, %37 : vector<8x256xf32>
    %40 = tpu.reciprocal %39 {approx = true} : vector<8x256xf32> -> vector<8x256xf32>
    %c0_29 = arith.constant 0 : index
    %c0_30 = arith.constant 0 : index
    %41 = vector.load %arg11[%c0_29, %c0_30] : memref<8x256xf32, #tpu.memory_space<vmem>>, vector<8x256xf32>
    tpu.vector_store %arg11[%c0_29, %c0_30], %40 {strides = array<i32>} : memref<8x256xf32, #tpu.memory_space<vmem>>, vector<8x256xf32>,
    return
  }
  func.func @transform_0(%arg0: i32) -> (i32, i32) {
    %c0_i32 = arith.constant 0 : i32
    %c0_i32_0 = arith.constant 0 : i32
    return %arg0, %c0_i32 : i32, i32
  }
  func.func @transform_1(%arg0: i32) -> (i32, i32) {
    %c0_i32 = arith.constant 0 : i32
    %c0_i32_0 = arith.constant 0 : i32
    return %arg0, %c0_i32 : i32, i32
  }
  func.func @transform_2(%arg0: i32) -> (i32, i32) {
    %c0_i32 = arith.constant 0 : i32
    %c0_i32_0 = arith.constant 0 : i32
    %c0_i32_1 = arith.constant 0 : i32
    return %c0_i32, %c0_i32_0 : i32, i32
  }
  func.func @transform_3(%arg0: i32) -> (i32, i32) {
    %c0_i32 = arith.constant 0 : i32
    %c0_i32_0 = arith.constant 0 : i32
    %c0_i32_1 = arith.constant 0 : i32
    return %c0_i32, %c0_i32_0 : i32, i32
  }
  func.func @transform_4(%arg0: i32) -> (i32, i32) {
    %c0_i32 = arith.constant 0 : i32
    %c0_i32_0 = arith.constant 0 : i32
    %c0_i32_1 = arith.constant 0 : i32
    return %c0_i32, %c0_i32_0 : i32, i32
  }
  func.func @transform_5(%arg0: i32) -> (i32, i32) {
    %c0_i32 = arith.constant 0 : i32
    %c0_i32_0 = arith.constant 0 : i32
    %c0_i32_1 = arith.constant 0 : i32
    return %c0_i32, %c0_i32_0 : i32, i32
  }
  func.func @transform_6(%arg0: i32) -> (i32, i32) {
    %c0_i32 = arith.constant 0 : i32
    %c0_i32_0 = arith.constant 0 : i32
    %c0_i32_1 = arith.constant 0 : i32
    return %c0_i32, %c0_i32_0 : i32, i32
  }
  func.func @transform_7(%arg0: i32) -> (i32, i32) {
    %c0_i32 = arith.constant 0 : i32
    %c0_i32_0 = arith.constant 0 : i32
    %c0_i32_1 = arith.constant 0 : i32
    return %c0_i32, %c0_i32_0 : i32, i32
  }
  func.func @transform_8(%arg0: i32) -> (i32, i32) {
    %c0_i32 = arith.constant 0 : i32
    %c0_i32_0 = arith.constant 0 : i32
    %c0_i32_1 = arith.constant 0 : i32
    return %c0_i32, %c0_i32_0 : i32, i32
  }
  func.func @transform_9(%arg0: i32) -> (i32, i32) {
    %c0_i32 = arith.constant 0 : i32
    %c0_i32_0 = arith.constant 0 : i32
    %c0_i32_1 = arith.constant 0 : i32
    return %c0_i32, %c0_i32_0 : i32, i32
  }
  func.func @transform_10(%arg0: i32) -> (i32, i32) {
    %c0_i32 = arith.constant 0 : i32
    %c0_i32_0 = arith.constant 0 : i32
    return %arg0, %c0_i32 : i32, i32
  }
  func.func @transform_11(%arg0: i32) -> (i32, i32) {
    %c0_i32 = arith.constant 0 : i32
    %c0_i32_0 = arith.constant 0 : i32
    return %arg0, %c0_i32 : i32, i32
  }
}

</mosaic_0001>

<bundles_post_ra>
// kernel: tpu_custom_call.1
= control target key start
LH: loop header
LB: loop body
LE: loop exit
PB: predicated region body
PF: predicated region fallthrough
CT: control target
= control target key end

     0   :  { %s1742_s0 = inlined_call_operand.hbm [shape: f32[16,256], index: 0, kind: input, shape index: {}]   ;;  %s1743_s1 = inlined_call_operand.hbm [shape: f32[16,64], index: 1, kind: input, shape index: {}]   ;;  %s1744_s2 = inlined_call_operand.hbm [shape: f32[256,128], index: 2, kind: input, shape index: {}]   ;;  %s1745_s3 = inlined_call_operand.vmem [shape: f32[1,128], index: 3, kind: input, shape index: {}]   ;;  %s1746_s4 = inlined_call_operand.hbm [shape: f32[128,128], index: 4, kind: input, shape index: {}]   ;;  %s1747_s5 = inlined_call_operand.vmem [shape: f32[1,128], index: 5, kind: input, shape index: {}]   ;;  %s1748_s6 = inlined_call_operand.hbm [shape: f32[64,128], index: 6, kind: input, shape index: {}]   ;;  %s1749_s7 = inlined_call_operand.vmem [shape: f32[1,128], index: 7, kind: input, shape index: {}]   ;;  %s1750_s8 = inlined_call_operand.hbm [shape: f32[128,256], index: 8, kind: input, shape index: {}]   ;;  %s1751_s9 = inlined_call_operand.vmem [shape: f32[1,256], index: 9, kind: input, shape index: {}]   ;;  %s1752_s10 = inlined_call_operand.hbm [shape: f32[16,256], index: 10, kind: output, shape index: {0}]   ;;  %s1753_s11 = inlined_call_operand.hbm [shape: f32[16,128], index: 11, kind: output, shape index: {1}]  }
   0x1   :  { %1760 = sst [smem:[#allocation28_spill]] %s1744_s2 }
   0x2   :  { %1761 = sst [smem:[#allocation29_spill]] %s1746_s4 }
   0x3   :  { %1762 = sst [smem:[#allocation30_spill]] %s1748_s6 }
   0x4   :  { %1763 = sst [smem:[#allocation31_spill]] %s1750_s8 }
   0x5   :  { %1764 = sst [smem:[#allocation32_spill]] %s1752_s10 }
   0x6   :  { %17 = vsyncpa [#allocation3], 0 }
   0x7   :  { %19 = vsyncpa [#allocation3 + $0x1], 0 }
   0x8   :  { %20 = vsyncpa [#allocation6], 0 }
   0x9   :  { %22 = vsyncpa [#allocation6 + $0x1], 0 }
   0xa   :  { %23 = vsyncpa [#allocation9], 0 }
   0xb   :  { %24 = vsyncpa [#allocation12], 0 }
   0xc   :  { %25 = vsyncpa [#allocation4], 0 }
   0xd   :  { %27 = vsyncpa [#allocation4 + $0x1], 0 }
   0xe   :  { %28 = vsyncpa [#allocation15], 0 }
   0xf   :  { %30 = vsyncpa [#allocation15 + $0x1], 0  ;;  %s1490_s17 = smov 0   ;;  %s1492_s18 = smov 0  }
  0x10   :  { %s1494_s19 = smov 0   ;;  %s1496_s20 = smov 0  }
  0x11 LB: > { %1765 = sst [smem:[#allocation23_spill]] %s1407_s17  ;;  %s1514_s24 = sadd.s32 4294967295, %s1419_s20   ;;  %s1419_s20 = sphi %s1496_s20, %s1785_s20   ;;  %s1415_s19 = sphi %s1494_s19, %s1787_s19   ;;  %s1411_s18 = sphi %s1492_s18, %s1789_s18   ;;  %s1407_s17 = sphi %s1490_s17, %s1788_s17  }
  0x12   : > { %1766 = sst [smem:[#allocation24_spill]] %s1415_s19  ;;  %p980_p0 = scmp.ge.s32.totalorder %s1419_s20, 1 }
  0x13   : > { %s1767_s2 = sld [smem:[#allocation28_spill]]  ;;  %p57_p1 = scmp.eq.s32.totalorder %s1514_s24, 0 }
  0x14   : > { %p313_p2 = scmp.lt.s32.totalorder %s1419_s20, 3  ;;  %s1421_s26 = smov [#allocation7]  }
  0x15   : > { %s326_s27 = sshll.u32 %s1421_s26, 4  ;;  %s1769_s4 = sld [smem:[#allocation29_spill]]  ;;  %s327_s27 = int_to_ptr.vmem [resolvable:$true] %s326_s27 }
  0x16   : > { %p1519_p3 = pnand %p980_p0, %p313_p2  ;;  %s1771_s6 = sld [smem:[#allocation30_spill]] }
  0x17   : > { %s1422_s16 = smov [#allocation8]   ;;  %s1423_s22 = smov 128  }
  0x18   : > { %p1034_p4 = pneg %p1519_p3  ;;  %s343_s21 = sshll.u32 %s1422_s16, 4  ;;  %s344_s21 = int_to_ptr.vmem [resolvable:$true] %s343_s21 }
  0x19   : > { %s324_s23 = sshll.u32 %s1767_s2, 4  ;;  %s1424_s26 = smov 8   ;;  %s325_s23 = int_to_ptr.hbm [resolvable:$true] %s324_s23 }
  0x1a   : > { %p1531_p6 = pnand %p1034_p4, %p57_p1  ;;  %s1772_s8 = sld [smem:[#allocation31_spill]] }
  0x1b   : > { %s341_s30 = sshll.u32 %s1769_s4, 4  ;;  %s1425_s14 = smov [#allocation10]   ;;  %s342_s30 = int_to_ptr.hbm [resolvable:$true] %s341_s30 }
  0x1c   : > { %s358_s15 = sshll.u32 %s1771_s6, 4  ;;  %s360_s16 = sshll.u32 %s1425_s14, 4  ;;  %s359_s15 = int_to_ptr.hbm [resolvable:$true] %s358_s15  ;;  %s361_s16 = int_to_ptr.vmem [resolvable:$true] %s360_s16 }
  0x1d   : > { %1037 = dma.hbm_to_vmem [thread:$0]  (!%p1531_p6), %s325_s23, 4096, %s327_s27, [#allocation6], %s1423_s22, %s1423_s22, %s1424_s26  }
  0x1e   : > { %1040 = dma.hbm_to_vmem [thread:$0]  (!%p1531_p6), %s342_s30, 2048, %s344_s21, [#allocation9], %s1423_s22, %s1423_s22, %s1424_s26  }
  0x1f   : > { %1043 = dma.hbm_to_vmem [thread:$0]  (!%p1531_p6), %s359_s15, 1024, %s361_s16, [#allocation9], %s1423_s22, %s1423_s22, %s1424_s26  }
  0x20   : > { %s375_s13 = sshll.u32 %s1772_s8, 4  ;;  %s1426_s23 = smov [#allocation11]   ;;  %s376_s13 = int_to_ptr.hbm [resolvable:$true] %s375_s13 }
  0x21   : > { %s377_s27 = sshll.u32 %s1426_s23, 4  ;;  %s1427_s30 = smov 256   ;;  %s378_s27 = int_to_ptr.vmem [resolvable:$true] %s377_s27 }
  0x22   : > { %s1428_s21 = smov 16   ;;  %s979_s28 = sadd.s32 4294967294, %s1419_s20  }
  0x23   : > { %1046 = dma.hbm_to_vmem [thread:$0]  (!%p1531_p6), %s376_s13, 4096, %s378_s27, [#allocation12], %s1427_s30, %s1427_s30, %s1428_s21  }
  0x24   : > { %s1551_s29 = sadd.s32 1, %s1419_s20   ;;  %s43_s2 = sadd.s32 1, %s1415_s19 }
  0x25   : > { %1773 = sst [smem:[#allocation25_spill]] %s1551_s29  ;;  %s40_s14 = ssub.s32 %s1419_s20, %s1551_s29 }
  0x26   : > { %p41_p7 = scmp.eq.s32.totalorder %s40_s14, 0  ;;  %p50_p8 = scmp.ne.s32.totalorder %s1415_s19, %s1411_s18 }
  0x27   : > { %p51_p9 = scmp.eq.s32.totalorder %s1419_s20, 0  ;;  %p56_p10 = scmp.ne.s32.totalorder %s1411_s18, %s1407_s17 }
  0x28   : > { %s1562_s15 = scalar_select %p41_p7, %s1415_s19, %s43_s2  }
  0x29   : > { %p1564_p11 = por %p51_p9, %p50_p8  ;;  %p1570_p12 = por %p57_p1, %p56_p10 }
  0x2a   : > { %1774 = sst [smem:[#allocation26_spill]] %s1562_s15  ;;  %p274_p13 = scmp.eq.s32.totalorder %s1514_s24, 1 }
  0x2b   : > { %p280_p0 = scmp.eq.s32.totalorder %s979_s28, 1  ;;  %p1065_p2 = scmp.lt.s32.totalorder %s1419_s20, 2 }
  0x2c   : > { %s1577_s26 = sand.u32 1, %s1415_s19   ;;  %p1579_p4 = por %p274_p13, %p50_p8 }
  0x2d   : > { %p1583_p6 = por %p280_p0, %p56_p10  ;;  %s986_s16 = sshll.u32 %s1577_s26, 4 }
  0x2e   : > { %s1008_s23 = sshll.u32 %s1419_s20, 4  ;;  %s398_s28 = scalar_lea.vmem [#allocation2], %s986_s16 }
  0x2f   : > { %s1778_s13 = scalar_select %p1583_p6, 1, 0 }
  0x30   : > { %s403_s21 = scalar_lea.hbm %s1742_s0, %s1008_s23  ;;  %s407_s14 = sshll.u32 %s398_s28, 4  ;;  %s408_s14 = int_to_ptr.vmem [resolvable:$true] %s407_s14 }
  0x31   : > { %1779 = sst [smem:[#allocation27_spill]] %s1778_s13  ;;  %s405_s4 = sshll.u32 %s403_s21, 4  ;;  %s406_s4 = int_to_ptr.hbm [resolvable:$true] %s405_s4 }
  0x32   : > { %p1594_p7 = pnand %p1065_p2, %p1564_p11  ;;  %s414_s8 = sand.u32 1, %s1419_s20  }
  0x33   : > { %s989_s15 = sshll.u32 %s1577_s26, 3  ;;  %s395_s19 = scalar_lea.sflag [#allocation3], %s1577_s26 }
  0x34   : > { %s1245_s29 = sshra.s32 %s406_s4, 4  ;;  %p1249_p9 = pneg %p1594_p7  ;;  %s1246_s29 = int_to_ptr.hbm [resolvable:$true] %s1245_s29 }
  0x35   : > { %s1247_s13 = scalar_lea.hbm %s1246_s29, 16  ;;  %s1252_s23 = scalar_lea.hbm %s1742_s0, 32 }
  0x36   : > { %p1248_p8 = scmp.ne.s32.totalorder %s1246_s29, %s1247_s13  ;;  %p1253_p11 = scmp.lt.s32.totalorder %s1246_s29, %s1742_s0 }
  0x37   : > { %p1254_p0 = scmp.lt.s32.totalorder %s1252_s23, %s1247_s13 }
  0x38   : > { %p1250_p10 = pnand %p1249_p9, %p1248_p8 }
  0x39   : > { %p1255_p2 = por %p1254_p0, %p1253_p11 }
  0x3a   : > { %p1251_p13 = pneg %p1250_p10 }
  0x3c   : > { %p1256_p5 = pnand %p1255_p2, %p1251_p13 }
  0x3e   : > { %1259 = shalt.err (!%p1256_p5)
}
  0x3f   : > { %1050 = dma.hbm_to_vmem [thread:$0]  (!%p1594_p7), %s406_s4, 256, %s408_s14, %s395_s19  }
  0x40   : > { %s990_s26 = sshll.u32 %s1419_s20, 3  ;;  %s418_s22 = scalar_lea.vmem [#allocation5], %s989_s15 }
  0x41   : > { %s422_s17 = scalar_lea.hbm %s1743_s1, %s990_s26  ;;  %s426_s16 = sshll.u32 %s418_s22, 4  ;;  %s427_s16 = int_to_ptr.vmem [resolvable:$true] %s426_s16 }
  0x42   : > { %s424_s10 = sshll.u32 %s422_s17, 4  ;;  %s415_s29 = scalar_lea.sflag [#allocation6], %s414_s8  ;;  %s425_s10 = int_to_ptr.hbm [resolvable:$true] %s424_s10 }
  0x43   : > { %s1275_s13 = sshra.s32 %s425_s10, 4  ;;  %s1282_s14 = scalar_lea.hbm %s1743_s1, 16  ;;  %s1276_s13 = int_to_ptr.hbm [resolvable:$true] %s1275_s13 }
  0x44   : > { %s1277_s23 = scalar_lea.hbm %s1276_s13, 8  ;;  %p1283_p13 = scmp.lt.s32.totalorder %s1276_s13, %s1743_s1 }
  0x45   : > { %p1278_p5 = scmp.ne.s32.totalorder %s1276_s13, %s1277_s23  ;;  %p1284_p11 = scmp.lt.s32.totalorder %s1282_s14, %s1277_s23 }
  0x47   : > { %p1280_p8 = pnand %p1278_p5, %p1249_p9  ;;  %p1285_p0 = por %p1284_p11, %p1283_p13 }
  0x49   : > { %p1281_p10 = pneg %p1280_p8 }
  0x4b   : > { %p1286_p2 = pnand %p1285_p0, %p1281_p10 }
  0x4d   : > { %1289 = shalt.err (!%p1286_p2)
}
  0x4e   : > { %1053 = dma.hbm_to_vmem [thread:$0]  (!%p1594_p7), %s425_s10, 128, %s427_s16, %s415_s29  }
  0x4f   : > { %435 = sbr.rel (%p1519_p3) target bundleno = 817 (0x331), region = 60  ;;  %s1632_s8 = sand.u32 (!%p1519_p3), 1, %s1411_s18  }
  0x50   : > { %s992_s17 = sshll.u32 (!%p1519_p3), %s1632_s8, 4  ;;  %s438_s15 = scalar_lea.sflag (!%p1519_p3), [#allocation3], %s1632_s8 }
  0x51   : > { %s1638_s26 = scalar_lea.vmem (!%p1519_p3), [#allocation2], %s992_s17 }
  0x54   : > { %1378 = dma.done.wait (%p1570_p12), %s438_s15, 256  }
  0x55   : > { %1380 = vsyncadd (%p1570_p12), %s438_s15, 4294967040  ;;  %s447_s6 = sand.u32 1, %s1514_s24   ;;  %s993_s10 = sshll.u32 %s1632_s8, 3 }
  0x56   : > { %s448_s25 = scalar_lea.sflag [#allocation6], %s447_s6  ;;  %s1648_s21 = scalar_lea.vmem [#allocation5], %s993_s10 }
  0x57   : > { %1382 = dma.done.wait (%p1570_p12), %s448_s25, 128  }
  0x58   : > { %1384 = vsyncadd (%p1570_p12), %s448_s25, 4294967168 }
  0x59   : > { %1386 = dma.done.wait (%p57_p1), [#allocation6], 4096  }
  0x5a   : > { %1388 = vsyncadd (%p57_p1), [#allocation6], 4294963200 }
  0x5b   : > { %1390 = dma.done.wait (%p57_p1), [#allocation9], 3072  }
  0x5c   : > { %1392 = vsyncadd (%p57_p1), [#allocation9], 4294964224 }
  0x5d   : > { %1394 = dma.done.wait (%p57_p1), [#allocation12], 4096  }
  0x5e   : > { %1396 = vsyncadd (%p57_p1), [#allocation12], 4294963200  ;;  %v538_v0 = vld [vmem:[#allocation7 + $0x78] sm:$0xff]  ;;  %v537_v1 = vld [vmem:[#allocation7 + $0x70] sm:$0xff]  ;;  %s1678_s29 = scalar_lea.vmem [#allocation14], %s993_s10  ;;  %s1429_s13 = smov 64  }
  0x5f   : > { %v554_v2 = vld [vmem:[#allocation7 + $0xf8] sm:$0xff]  ;;  %559 = vmatpush.msra.mxu0 %v538_v0  ;;  %v553_v3 = vld [vmem:[#allocation7 + $0xf0] sm:$0xff]  ;;  %v536_v4 = vld [vmem:[#allocation7 + $0x68] sm:$0xff]  ;;  %vm664_vm0 = vcmask 523264   ;;  %s1005_s19 = sshll.u32 %s1514_s24, 3  ;;  %s812_s15 = sshll.u32 %s1678_s29, 4  ;;  %s813_s15 = int_to_ptr.vmem [resolvable:$true] %s812_s15 }
  0x60   : > { %579 = vmatpush.msra.mxu1 %v554_v2  ;;  %v552_v5 = vld [vmem:[#allocation7 + $0xe8] sm:$0xff]  ;;  %v535_v6 = vld [vmem:[#allocation7 + $0x60] sm:$0xff]  ;;  %v534_v8 = vld [vmem:[#allocation7 + $0x58] sm:$0xff]  ;;  %s810_s30 = scalar_lea.hbm %s1753_s11, %s1005_s19  ;;  %s785_s6 = scalar_lea.sflag [#allocation15], %s1632_s8 }
  0x61   : > { %560 = vmatpush.msra.mxu0 %v537_v1  ;;  %v551_v7 = vld [vmem:[#allocation7 + $0xe0] sm:$0xff]  ;;  %v550_v9 = vld [vmem:[#allocation7 + $0xd8] sm:$0xff]  ;;  %v533_v10 = vld [vmem:[#allocation7 + $0x50] sm:$0xff]  ;;  %s1325_s28 = scalar_lea.hbm %s1753_s11, 16 }
  0x62   : > { %580 = vmatpush.msra.mxu1 %v553_v3  ;;  %v549_v11 = vld [vmem:[#allocation7 + $0xd0] sm:$0xff]  ;;  %v532_v12 = vld [vmem:[#allocation7 + $0x48] sm:$0xff]  ;;  %v616_v14 = vld [vmem:[#allocation8 + $0x78] sm:$0xff] }
  0x63   : > { %561 = vmatpush.msra.mxu0 %v536_v4  ;;  %v548_v13 = vld [vmem:[#allocation7 + $0xc8] sm:$0xff]  ;;  %v615_v15 = vld [vmem:[#allocation8 + $0x70] sm:$0xff]  ;;  %v531_v16 = vld [vmem:[#allocation7 + $0x40] sm:$0xff]  ;;  %621 = vmatpush.msra.mxu2 %v616_v14 }
  0x64   : > { %581 = vmatpush.msra.mxu1 %v552_v5  ;;  %v547_v17 = vld [vmem:[#allocation7 + $0xc0] sm:$0xff]  ;;  %v614_v18 = vld [vmem:[#allocation8 + $0x68] sm:$0xff]  ;;  %v530_v19 = vld [vmem:[#allocation7 + $0x38] sm:$0xff] }
  0x65   : > { %562 = vmatpush.msra.mxu0 %v535_v6  ;;  %v546_v20 = vld [vmem:[#allocation7 + $0xb8] sm:$0xff]  ;;  %622 = vmatpush.msra.mxu2 %v615_v15  ;;  %v613_v21 = vld [vmem:[#allocation8 + $0x60] sm:$0xff]  ;;  %v529_v22 = vld [vmem:[#allocation7 + $0x30] sm:$0xff] }
  0x66   : > { %582 = vmatpush.msra.mxu1 %v551_v7  ;;  %v545_v23 = vld [vmem:[#allocation7 + $0xb0] sm:$0xff]  ;;  %v612_v24 = vld [vmem:[#allocation8 + $0x58] sm:$0xff]  ;;  %v528_v25 = vld [vmem:[#allocation7 + $0x28] sm:$0xff] }
  0x67   : > { %563 = vmatpush.msra.mxu0 %v534_v8  ;;  %623 = vmatpush.msra.mxu2 %v614_v18  ;;  %v544_v26 = vld [vmem:[#allocation7 + $0xa8] sm:$0xff]  ;;  %v611_v27 = vld [vmem:[#allocation8 + $0x50] sm:$0xff]  ;;  %v527_v28 = vld [vmem:[#allocation7 + $0x20] sm:$0xff] }
  0x68   : > { %583 = vmatpush.msra.mxu1 %v550_v9  ;;  %v543_v29 = vld [vmem:[#allocation7 + $0xa0] sm:$0xff]  ;;  %v610_v30 = vld [vmem:[#allocation8 + $0x48] sm:$0xff]  ;;  %v526_v31 = vld [vmem:[#allocation7 + $0x18] sm:$0xff] }
  0x69   : > { %564 = vmatpush.msra.mxu0 %v533_v10  ;;  %624 = vmatpush.msra.mxu2 %v613_v21  ;;  %v542_v32 = vld [vmem:[#allocation7 + $0x98] sm:$0xff]  ;;  %v609_v33 = vld [vmem:[#allocation8 + $0x40] sm:$0xff]  ;;  %v525_v34 = vld [vmem:[#allocation7 + $0x10] sm:$0xff] }
  0x6a   : > { %584 = vmatpush.msra.mxu1 %v549_v11  ;;  %v541_v35 = vld [vmem:[#allocation7 + $0x90] sm:$0xff]  ;;  %v608_v36 = vld [vmem:[#allocation8 + $0x38] sm:$0xff]  ;;  %v524_v37 = vld [vmem:[#allocation7 + $0x8] sm:$0xff] }
  0x6b   : > { %565 = vmatpush.msra.mxu0 %v532_v12  ;;  %625 = vmatpush.msra.mxu2 %v612_v24  ;;  %v540_v38 = vld [vmem:[#allocation7 + $0x88] sm:$0xff]  ;;  %v607_v39 = vld [vmem:[#allocation8 + $0x30] sm:$0xff]  ;;  %v523_v40 = vld [vmem:[#allocation7] sm:$0xff] }
  0x6c   : > { %585 = vmatpush.msra.mxu1 %v548_v13  ;;  %v539_v41 = vld [vmem:[#allocation7 + $0x80] sm:$0xff]  ;;  %v522_v43 = vld [vmem:[%s1638_s26 + $0x8] sm:$0xff]  ;;  %v603_v47 = vld [vmem:[#allocation8 + $0x10] sm:$0xff] }
  0x6d   : > { %566 = vmatpush.msra.mxu0 %v531_v16  ;;  %626 = vmatpush.msra.mxu2 %v611_v27  ;;  %v521_v42 = vld [vmem:[%s1638_s26] sm:$0xff]  ;;  %v606_v44 = vld [vmem:[#allocation8 + $0x28] sm:$0xff]  ;;  %v604_v46 = vld [vmem:[#allocation8 + $0x18] sm:$0xff]  ;;  %s814_s26 = sshll.u32 %s810_s30, 4  ;;  %s815_s26 = int_to_ptr.hbm [resolvable:$true] %s814_s26 }
  0x6e   : > { %586 = vmatpush.msra.mxu1 %v547_v17  ;;  %v605_v45 = vld [vmem:[#allocation8 + $0x20] sm:$0xff]  ;;  %v602_v48 = vld [vmem:[#allocation8 + $0x8] sm:$0xff]  ;;  %v1112_v50 = vld [vmem:[%s1745_s3] ss:$0 sm:$0xff]  ;;  %s1319_s10 = sshra.s32 %s815_s26, 4  ;;  %s1320_s10 = int_to_ptr.hbm [resolvable:$true] %s1319_s10 }
  0x6f   : > { %567 = vmatpush.msra.mxu0 %v530_v19  ;;  %627 = vmatpush.msra.mxu2 %v610_v30  ;;  %v601_v49 = vld [vmem:[#allocation8] sm:$0xff]  ;;  %v659_v57 = vld [vmem:[#allocation10 + $0x38] sm:$0xff]  ;;  %v658_v58 = vld [vmem:[#allocation10 + $0x30] sm:$0xff]  ;;  %s1321_s25 = scalar_lea.hbm %s1320_s10, 8  ;;  %p1326_p7 = scmp.lt.s32.totalorder %s1320_s10, %s1753_s11 }
  0x70   : > { %587 = vmatpush.msra.mxu1 %v546_v20  ;;  %676 = vmatpush.msra.mxu3 %v659_v57  ;;  %v657_v59 = vld [vmem:[#allocation10 + $0x28] sm:$0xff]  ;;  %v656_v60 = vld [vmem:[#allocation10 + $0x20] sm:$0xff]  ;;  %v655_v61 = vld [vmem:[#allocation10 + $0x18] sm:$0xff]  ;;  %p1322_p1 = scmp.ne.s32.totalorder %s1320_s10, %s1321_s25  ;;  %p1327_p9 = scmp.lt.s32.totalorder %s1325_s28, %s1321_s25 }
  0x71   : > { %568 = vmatpush.msra.mxu0 %v529_v22  ;;  %628 = vmatpush.msra.mxu2 %v609_v33  ;;  %v1113_v62 = vld [vmem:[%s1747_s5] ss:$0 sm:$0xff]  ;;  %v653_v5 = vld [vmem:[#allocation10 + $0x8] sm:$0xff]  ;;  %v652_v6 = vld [vmem:[#allocation10] sm:$0xff] }
  0x72   : > { %588 = vmatpush.msra.mxu1 %v545_v23  ;;  %677 = vmatpush.msra.mxu3 %v658_v58  ;;  %v654_v4 = vld [vmem:[#allocation10 + $0x10] sm:$0xff]  ;;  %v720_v8 = vld [vmem:[#allocation11 + $0xf8] sm:$0xff]  ;;  %v717_v9 = vld [vmem:[#allocation11 + $0xe0] sm:$0xff]  ;;  %p1323_p3 = pnand %p1322_p1, %p1579_p4  ;;  %p1328_p5 = por %p1327_p9, %p1326_p7 }
  0x73   : > { %569 = vmatpush.msra.mxu0 %v528_v25  ;;  %629 = vmatpush.msra.mxu2 %v608_v36  ;;  %v719_v7 = vld [vmem:[#allocation11 + $0xf0] sm:$0xff]  ;;  %v718_v10 = vld [vmem:[#allocation11 + $0xe8] sm:$0xff]  ;;  %v716_v12 = vld [vmem:[#allocation11 + $0xd8] sm:$0xff] }
  0x74   : > { %589 = vmatpush.msra.mxu1 %v544_v26  ;;  %678 = vmatpush.msra.mxu3 %v657_v59  ;;  %v715_v11 = vld [vmem:[#allocation11 + $0xd0] sm:$0xff]  ;;  %v713_v13 = vld [vmem:[#allocation11 + $0xc0] sm:$0xff]  ;;  %v714_v14 = vld [vmem:[#allocation11 + $0xc8] sm:$0xff]  ;;  %p1324_p12 = pneg %p1323_p3 }
  0x75   : > { %570 = vmatpush.msra.mxu0 %v527_v28  ;;  %630 = vmatpush.msra.mxu2 %v607_v39  ;;  %v711_v15 = vld [vmem:[#allocation11 + $0xb0] sm:$0xff]  ;;  %v712_v16 = vld [vmem:[#allocation11 + $0xb8] sm:$0xff]  ;;  %v709_v17 = vld [vmem:[#allocation11 + $0xa0] sm:$0xff] }
  0x76   : > { %590 = vmatpush.msra.mxu1 %v543_v29  ;;  %679 = vmatpush.msra.mxu3 %v656_v60  ;;  %v710_v18 = vld [vmem:[#allocation11 + $0xa8] sm:$0xff]  ;;  %v707_v19 = vld [vmem:[#allocation11 + $0x90] sm:$0xff]  ;;  %v708_v20 = vld [vmem:[#allocation11 + $0x98] sm:$0xff]  ;;  %p1329_p8 = pnand %p1328_p5, %p1324_p12 }
  0x77   : > { %571 = vmatpush.msra.mxu0 %v526_v31  ;;  %631 = vmatpush.msra.mxu2 %v606_v44  ;;  %v705_v21 = vld [vmem:[#allocation11 + $0x80] sm:$0xff]  ;;  %v706_v22 = vld [vmem:[#allocation11 + $0x88] sm:$0xff]  ;;  %v703_v23 = vld [vmem:[#allocation11 + $0x70] sm:$0xff] }
  0x78   : > { %591 = vmatpush.msra.mxu1 %v542_v32  ;;  %680 = vmatpush.msra.mxu3 %v655_v61  ;;  %v704_v24 = vld [vmem:[#allocation11 + $0x78] sm:$0xff]  ;;  %v701_v25 = vld [vmem:[#allocation11 + $0x60] sm:$0xff]  ;;  %v702_v26 = vld [vmem:[#allocation11 + $0x68] sm:$0xff] }
  0x79   : > { %572 = vmatpush.msra.mxu0 %v525_v34  ;;  %632 = vmatpush.msra.mxu2 %v605_v45  ;;  %v699_v27 = vld [vmem:[#allocation11 + $0x50] sm:$0xff]  ;;  %v700_v28 = vld [vmem:[#allocation11 + $0x58] sm:$0xff]  ;;  %v697_v29 = vld [vmem:[#allocation11 + $0x40] sm:$0xff] }
  0x7a   : > { %592 = vmatpush.msra.mxu1 %v541_v35  ;;  %681 = vmatpush.msra.mxu3 %v654_v4  ;;  %v698_v30 = vld [vmem:[#allocation11 + $0x48] sm:$0xff]  ;;  %v695_v31 = vld [vmem:[#allocation11 + $0x30] sm:$0xff]  ;;  %v696_v32 = vld [vmem:[#allocation11 + $0x38] sm:$0xff] }
  0x7b   : > { %573 = vmatpush.msra.mxu0 %v524_v37  ;;  %633 = vmatpush.msra.mxu2 %v604_v46  ;;  %v642_v33 = vld [vmem:[%s1648_s21] sm:$0xff]  ;;  %v693_v37 = vld [vmem:[#allocation11 + $0x20] sm:$0xff] }
  0x7c   : > { %593 = vmatpush.msra.mxu1 %v540_v38  ;;  %682 = vmatpush.msra.mxu3 %v653_v5  ;;  %v694_v38 = vld [vmem:[#allocation11 + $0x28] sm:$0xff]  ;;  %v691_v39 = vld [vmem:[#allocation11 + $0x10] sm:$0xff] }
  0x7d   : > { %574 = vmatpush.msra.mxu0 %v523_v40  ;;  %634 = vmatpush.msra.mxu2 %v603_v47  ;;  %v692_v40 = vld [vmem:[#allocation11 + $0x18] sm:$0xff] }
  0x7e   : > { %594 = vmatpush.msra.mxu1 %v539_v41  ;;  %575 = vmatmul.f32.vlgmr.msra.gmra.mxu0 %v521_v42  ;;  %v689_v41 = vld [vmem:[#allocation11] sm:$0xff]  ;;  %v690_v42 = vld [vmem:[#allocation11 + $0x8] sm:$0xff] }
  0x7f   : > { %595 = vmatmul.f32.vlgmr.msra.gmra.mxu1 %v522_v43  ;;  %635 = vmatpush.msra.mxu2 %v602_v48  ;;  %v1114_v43 = vld [vmem:[%s1749_s7] ss:$0 sm:$0xff] }
  0x80   : > { %683 = vmatpush.msra.mxu3 %v652_v6  ;;  %747 = vmatpush.msrb.mxu0 %v720_v8 }
  0x81   : > { %636 = vmatpush.msra.mxu2 %v601_v49 }
  0x82   : > { %727 = vmatpush.msrb.mxu3 %v719_v7  ;;  %748 = vmatpush.msrb.mxu0 %v718_v10 }
  0x84   : > { %728 = vmatpush.msrb.mxu3 %v717_v9  ;;  %749 = vmatpush.msrb.mxu0 %v716_v12 }
  0x86   : > { %729 = vmatpush.msrb.mxu3 %v715_v11  ;;  %750 = vmatpush.msrb.mxu0 %v714_v14 }
  0x88   : > { %730 = vmatpush.msrb.mxu3 %v713_v13  ;;  %751 = vmatpush.msrb.mxu0 %v712_v16 }
  0x8a   : > { %731 = vmatpush.msrb.mxu3 %v711_v15  ;;  %752 = vmatpush.msrb.mxu0 %v710_v18 }
  0x8c   : > { %732 = vmatpush.msrb.mxu3 %v709_v17  ;;  %753 = vmatpush.msrb.mxu0 %v708_v20 }
  0x8e   : > { %733 = vmatpush.msrb.mxu3 %v707_v19  ;;  %754 = vmatpush.msrb.mxu0 %v706_v22 }
  0x90   : > { %734 = vmatpush.msrb.mxu3 %v705_v21  ;;  %755 = vmatpush.msrb.mxu0 %v704_v24 }
  0x92   : > { %735 = vmatpush.msrb.mxu3 %v703_v23  ;;  %756 = vmatpush.msrb.mxu0 %v702_v26 }
  0x94   : > { %736 = vmatpush.msrb.mxu3 %v701_v25  ;;  %757 = vmatpush.msrb.mxu0 %v700_v28 }
  0x96   : > { %737 = vmatpush.msrb.mxu3 %v699_v27  ;;  %758 = vmatpush.msrb.mxu0 %v698_v30 }
  0x98   : > { %738 = vmatpush.msrb.mxu3 %v697_v29  ;;  %759 = vmatpush.msrb.mxu0 %v696_v32 }
  0x9a   : > { %739 = vmatpush.msrb.mxu3 %v695_v31  ;;  %760 = vmatpush.msrb.mxu0 %v694_v38 }
  0x9c   : > { %740 = vmatpush.msrb.mxu3 %v693_v37  ;;  %761 = vmatpush.msrb.mxu0 %v692_v40 }
  0x9e   : > { %741 = vmatpush.msrb.mxu3 %v691_v39  ;;  %762 = vmatpush.msrb.mxu0 %v690_v42 }
  0xa0   : > { %742 = vmatpush.msrb.mxu3 %v689_v41 }
  0xfb   : > { %v576_v51 = vpop.f32.mrf.mxu0 }
  0xfc   : > { %v596_v52 = vpop.f32.mrf.mxu1  ;;  %v577_v53 = vadd.f32 %v1112_v50, %v576_v51 }
  0xfe   : > { %v597_v54 = vadd.f32 %v596_v52, %v577_v53 }
 0x100   : > { %v599_v55 = vmul.f32 0.2, %v597_v54 }
 0x102   : > { %v600_v56 = vmax.f32 %v597_v54, %v599_v55 }
 0x104   : > { %637 = vmatmul.f32.vlgmr.msra.gmra.mxu2 %v600_v56 }
 0x187   : > { %v638_v63 = vpop.f32.mrf.mxu2 }
 0x188   : > { %v1674_v0 = vadd.f32 %v1113_v62, %v638_v63 }
 0x18a   : > { %641 = vst [vmem:[%s1678_s29] sm:$0xff] %v1674_v0  ;;  %v643_v1 = vmul.f32 0.5, %v1674_v0 }
 0x18c   : > { %v644_v2 = vmul.f32 1.442695, %v643_v1 }
 0x18e   : > { %1115 = vpow2.f32 %v644_v2 }
 0x194   : > { %v1116_v3 = vpop.eup %1115 }
 0x195   : > { %647 = vrot.lane.b32.xlu0 %v1116_v3, %s1429_s13 }
 0x207   : > { %v648_v34 = vpop.permute.xlu0 %647 }
 0x208   : > { %v650_v35 = vmul.f32 %v648_v34, %v642_v33 }
 0x20a   : > { %v651_v36 = vadd.f32 %v650_v35, %v1674_v0 }
 0x20c   : > { %1000 = vmatmul.msk.f32.vlgmr.msra.gmra.mxu3 %vm664_vm0, %v651_v36 }
 0x28f   : > { %v685_v44 = vpop.f32.mrf.mxu3 }
 0x290   : > { %v686_v45 = vadd.f32 %v1114_v43, %v685_v44 }
 0x292   : > { %v688_v46 = vmax.f32 %v686_v45, 0.0 }
 0x294   : > { %743 = vmatmul.f32.vlgmr.msrb.gmra.mxu3 %v688_v46  ;;  %763 = vmatmul.f32.vlgmr.msrb.gmra.mxu0 %v688_v46 }
 0x295   : > { %1332 = shalt.err (!%p1329_p8)
}
 0x296   : > { %1031 = dma.vmem_to_hbm [thread:$0]  (%p1579_p4), %s813_s15, 128, %s815_s26, %s785_s6   ;;  %v721_v47 = vld [vmem:[%s1751_s9] sm:$0x3] }
 0x297   : > { %v724_v48 = vperm.slane %v721_v47, 1  ;;  %v723_v52 = vperm.slane %v721_v47, 0  ;;  %s1009_s23 = sshll.u32 %s1514_s24, 4  ;;  %s1781_s14 = sld [smem:[#allocation32_spill]] }
 0x298   : > { %s513_s30 = scalar_lea.vmem [#allocation13], %s992_s17  ;;  %s780_s6 = scalar_lea.sflag [#allocation4], %s1632_s8 }
 0x299   : > { %s798_s15 = sshll.u32 %s513_s30, 4  ;;  %s799_s15 = int_to_ptr.vmem [resolvable:$true] %s798_s15 }
 0x29d   : > { %s796_s27 = scalar_lea.hbm %s1781_s14, %s1009_s23  ;;  %s1353_s12 = scalar_lea.hbm %s1781_s14, 32 }
 0x29e   : > { %s800_s26 = sshll.u32 %s796_s27, 4  ;;  %s801_s26 = int_to_ptr.hbm [resolvable:$true] %s800_s26 }
 0x29f   : > { %s1347_s24 = sshra.s32 %s801_s26, 4  ;;  %s1348_s24 = int_to_ptr.hbm [resolvable:$true] %s1347_s24 }
 0x2a0   : > { %s1349_s10 = scalar_lea.hbm %s1348_s24, 16  ;;  %p1354_p0 = scmp.lt.s32.totalorder %s1348_s24, %s1781_s14 }
 0x2a1   : > { %p1350_p10 = scmp.ne.s32.totalorder %s1348_s24, %s1349_s10  ;;  %p1355_p2 = scmp.lt.s32.totalorder %s1353_s12, %s1349_s10 }
 0x2a3   : > { %p1351_p13 = pnand %p1350_p10, %p1579_p4  ;;  %p1356_p1 = por %p1355_p2, %p1354_p0 }
 0x2a5   : > { %p1352_p11 = pneg %p1351_p13 }
 0x2a7   : > { %p1357_p3 = pnand %p1356_p1, %p1352_p11 }
 0x311   : > { %v764_v49 = vpop.f32.mrf.mxu0 }
 0x312   : > { %v765_v50 = vadd.f32 %v764_v49, %v724_v48 }
 0x314   : > { %v768_v51 = vsub.f32 0.0, %v765_v50 }
 0x316   : > { %v771_v53 = vmul.f32 1.442695, %v768_v51 }
 0x317   : > { %v744_v54 = vpop.f32.mrf.mxu3 }
 0x318   : > { %1117 = vpow2.f32 %v771_v53  ;;  %v745_v55 = vadd.f32 %v744_v54, %v723_v52 }
 0x31a   : > { %v767_v56 = vsub.f32 0.0, %v745_v55 }
 0x31c   : > { %v769_v57 = vmul.f32 1.442695, %v767_v56 }
 0x31e   : > { %v1118_v58 = vpop.eup %1117  ;;  %1119 = vpow2.f32 %v769_v57 }
 0x31f   : > { %v774_v59 = vadd.f32 1.0, %v1118_v58 }
 0x321   : > { %1121 = vrcp.f32 %v774_v59 }
 0x324   : > { %v1120_v60 = vpop.eup %1119 }
 0x325   : > { %v773_v61 = vadd.f32 1.0, %v1120_v60 }
 0x327   : > { %v1122_v62 = vpop.eup %1121  ;;  %1123 = vrcp.f32 %v773_v61 }
 0x328   : > { %778 = vst [vmem:[%s513_s30 + $0x8] sm:$0xff] %v1122_v62 }
 0x32d   : > { %v1124_v63 = vpop.eup %1123 }
 0x32e   : > { %777 = vst [vmem:[%s513_s30] sm:$0xff] %v1124_v63 }
 0x32f   : > { %1360 = shalt.err (!%p1357_p3)
}
 0x330   : > { %1030 = dma.vmem_to_hbm [thread:$0]  (%p1579_p4), %s799_s15, 256, %s801_s26, %s780_s6  }
 0x331 PF: > { %s1782_s8 = sld [smem:[#allocation23_spill]]  ;;  %p1784_p12 = scmp.ge.s32.totalorder %s1419_s20, 2 }
 0x333   : > { %p1055_p7 = pnand %p1784_p12, %p1583_p6 }
 0x335   : > { %p1056_p9 = pneg %p1055_p7 }
 0x337   : > { %s826_s16 = sand.u32 1, %s1782_s8  }
 0x338   : > { %s827_s29 = scalar_lea.sflag [#allocation4], %s826_s16 }
 0x339   : > { %1398 = dma.done.wait (%p1056_p9), %s827_s29, 256  }
 0x33a   : > { %1400 = vsyncadd (%p1056_p9), %s827_s29, 4294967040  ;;  %s837_s13 = scalar_lea.sflag [#allocation15], %s826_s16 }
 0x33b   : > { %1402 = dma.done.wait (%p1056_p9), %s837_s13, 128  }
 0x33c   : > { %1404 = vsyncadd (%p1056_p9), %s837_s13, 4294967168  ;;  %s1785_s20 = sld [smem:[#allocation25_spill]]  ;;  %s1788_s17 = smov %s1411_s18 }
 0x33d   : > { %s1786_s23 = sld [smem:[#allocation24_spill]] }
 0x33e   : > { %s1787_s19 = sld [smem:[#allocation26_spill]] }
 0x342   : > { %p33_p4 = scmp.ge.s32.totalorder %s1785_s20, 4  }
 0x343   : > { %s1789_s18 = smov %s1786_s23 }
 0x344   :  { %35 = sbr.rel (!%p33_p4) target bundleno = 17 (0x11), region = 151 }
 0x349   :  { %843 = vsyncpa [#allocation3], 1 }
 0x34a   :  { %845 = vsyncpa [#allocation3 + $0x1], 1 }
 0x34b   :  { %846 = vsyncpa [#allocation6], 1 }
 0x34c   :  { %848 = vsyncpa [#allocation6 + $0x1], 1 }
 0x34d   :  { %849 = vsyncpa [#allocation9], 1 }
 0x34e   :  { %850 = vsyncpa [#allocation12], 1 }
 0x34f   :  { %851 = vsyncpa [#allocation4], 1 }
 0x350   :  { %853 = vsyncpa [#allocation4 + $0x1], 1 }
 0x351   :  { %854 = vsyncpa [#allocation15], 1 }
 0x352   :  { %856 = vsyncpa [#allocation15 + $0x1], 1 }

</bundles_post_ra>
